<compile_context>
chip_gen: v5e
topology: v5e:2x2
jax: 0.10.0
libtpu: 0.0.40
codegen_flags: <defaults>
</compile_context>

<pallas_src>
import jax
import jax.numpy as jnp
from jax.experimental import pallas as pl
from jax.experimental.pallas import tpu as pltpu

LANE = 128      # vreg lane width
SUBLANE = 8     # vreg sublane count (f32)


def _round_up(n, m):
    return ((n + m - 1) // m) * m


def prepare_params(w1, b1, w2, b2, compute_dtype=jnp.float32):
    """One-time parameter prep (do at load time, NOT per forward call).

    PyTorch nn.Linear stores weights as [out, in]. Transpose once to put the
    contraction dim first ([S, Hp] / [Hp, Ap]) and zero-pad H, A up to
    multiples of 128 so all hidden/output traffic is lane-dense. Biases become
    2-D f32 rows. Padded hidden columns produce sigmoid(0)=0.5 activations, but
    the corresponding (zero-padded) rows of W2^T contribute nothing, and padded
    output columns are sliced away in the wrapper, so results are exact.
    """
    h_size, s_size = w1.shape
    a_size, _ = w2.shape
    hp = _round_up(h_size, LANE)
    ap = _round_up(a_size, LANE)

    w1t = jnp.zeros((s_size, hp), compute_dtype).at[:, :h_size].set(
        w1.T.astype(compute_dtype))
    w2t = jnp.zeros((hp, ap), compute_dtype).at[:h_size, :a_size].set(
        w2.T.astype(compute_dtype))
    b1p = jnp.zeros((1, hp), jnp.float32).at[0, :h_size].set(b1.astype(jnp.float32))
    b2p = jnp.zeros((1, ap), jnp.float32).at[0, :a_size].set(b2.astype(jnp.float32))
    return w1t, b1p, w2t, b2p, a_size


def mlp_kernel(x_ref, w1_ref, b1_ref, w2_ref, b2_ref, o_ref):
    # x:  [tb, S]     w1: [S, Hp]   b1: [1, Hp]
    # w2: [Hp, Ap]    b2: [1, Ap]   o:  [tb, Ap]
    x = x_ref[...]

    # x @ W1^T — weight already in [K, N] layout, native MXU feed.
    h = jnp.dot(x, w1_ref[...], preferred_element_type=jnp.float32)
    h = jax.nn.sigmoid(h + b1_ref[...])          # f32 epilogue (v5e-safe)

    # h @ W2^T
    a = jnp.dot(h.astype(w2_ref.dtype), w2_ref[...],
                preferred_element_type=jnp.float32)
    o_ref[...] = jax.nn.sigmoid(a + b2_ref[...]).astype(o_ref.dtype)


def mlp_forward(x, w1t, b1p, w2t, b2p, a_size, *, block_b=512):
    """x: [B, S]; params from prepare_params(). Returns [B, a_size] in x.dtype."""
    B, S = x.shape
    Hp = w1t.shape[1]
    Ap = w2t.shape[1]
    out_dtype = x.dtype

    # Cast activations to the matmul operand dtype (bf16 on v6e/v7x production).
    x = x.astype(w1t.dtype)

    # Batch tile: multiple of 8 sublanes, up to block_b rows per grid step.
    tb = min(_round_up(B, SUBLANE), block_b)
    Bp = _round_up(B, tb)
    if Bp != B:
        x = jnp.pad(x, ((0, Bp - B), (0, 0)))

    grid = (Bp // tb,)

    # TODO(synk): for production sizes on v7x (64 MiB VMEM / 32 MiB scoped
    # default), shrink block_b and set vmem_limit_bytes explicitly with
    # headroom for the double-buffered x / out tiles.
    out = pl.pallas_call(
        mlp_kernel,
        out_shape=jax.ShapeDtypeStruct((Bp, Ap), out_dtype),
        grid=grid,
        in_specs=[
            pl.BlockSpec((tb, S), lambda i: (i, 0)),    # x: batch-tiled
            pl.BlockSpec((S, Hp), lambda i: (0, 0)),    # W1^T: VMEM-resident
            pl.BlockSpec((1, Hp), lambda i: (0, 0)),    # b1
            pl.BlockSpec((Hp, Ap), lambda i: (0, 0)),   # W2^T: VMEM-resident
            pl.BlockSpec((1, Ap), lambda i: (0, 0)),    # b2
        ],
        out_specs=pl.BlockSpec((tb, Ap), lambda i: (i, 0)),
        compiler_params=pltpu.CompilerParams(
            dimension_semantics=("parallel",),          # shards batch over v7x's 2 TCs
        ),
    )(x, w1t, b1p, w2t, b2p)

    return out[:B, :a_size]


def reference_forward(x, w1, b1, w2, b2):
    h = jax.nn.sigmoid(x @ w1.T + b1)
    return jax.nn.sigmoid(h @ w2.T + b2)


if __name__ == "__main__":
    # topology = [s_size, h_size, a_size]
    s_size, h_size, a_size = 16, 32, 4
    batch = 8

    key = jax.random.PRNGKey(0)
    kx, k1, k2, k3, k4 = jax.random.split(key, 5)

    x = jax.random.normal(kx, (batch, s_size), dtype=jnp.float32)
    # Deterministic synthetic parameters in PyTorch nn.Linear [out, in] layout.
    w1 = jax.random.normal(k1, (h_size, s_size), dtype=jnp.float32) * 0.1
    b1 = jax.random.normal(k2, (h_size,), dtype=jnp.float32) * 0.1
    w2 = jax.random.normal(k3, (a_size, h_size), dtype=jnp.float32) * 0.1
    b2 = jax.random.normal(k4, (a_size,), dtype=jnp.float32) * 0.1

    # f32 compute here so the 1e-5 tolerance check is valid; use
    # compute_dtype=jnp.bfloat16 on v6e/v7x at production sizes.
    params = prepare_params(w1, b1, w2, b2, compute_dtype=jnp.float32)

    out = mlp_forward(x, *params)
    out = jax.block_until_ready(out)

    ref = reference_forward(x, w1, b1, w2, b2)
    assert out.shape == (batch, a_size)
    assert out.dtype == x.dtype
    assert jnp.allclose(out, ref, atol=1e-5, rtol=1e-5), "mismatch vs reference"

    print("KERNEL_OK")
</pallas_src>

<mosaic_0001>
module attributes {stable_mosaic.version = 11 : i64} {
  func.func @mlp_kernel(%arg0: i32, %arg1: memref<8x16xf32, #tpu.memory_space<vmem>>, %arg2: memref<16x128xf32, #tpu.memory_space<vmem>>, %arg3: memref<1x128xf32, #tpu.memory_space<vmem>>, %arg4: memref<128x128xf32, #tpu.memory_space<vmem>>, %arg5: memref<1x128xf32, #tpu.memory_space<vmem>>, %arg6: memref<8x128xf32, #tpu.memory_space<vmem>>) attributes {dimension_semantics = [#tpu.dimension_semantics<parallel>], iteration_bounds = array<i64: 1>, scalar_prefetch = 0 : i64, scratch_operands = 0 : i64, tpu.core_type = #tpu.core_type<tc>, window_params = [{transform_indices = @transform_0, window_bounds = array<i64: 8, 16>}, {pipeline_mode = #tpu.pipeline_mode<synchronous>, transform_indices = @transform_1, window_bounds = array<i64: 16, 128>}, {pipeline_mode = #tpu.pipeline_mode<synchronous>, transform_indices = @transform_2, window_bounds = array<i64: 1, 128>}, {pipeline_mode = #tpu.pipeline_mode<synchronous>, transform_indices = @transform_3, window_bounds = array<i64: 128, 128>}, {pipeline_mode = #tpu.pipeline_mode<synchronous>, transform_indices = @transform_4, window_bounds = array<i64: 1, 128>}, {transform_indices = @transform_5, window_bounds = array<i64: 8, 128>}]} {
    %c0 = arith.constant 0 : index
    %c0_0 = arith.constant 0 : index
    %0 = vector.load %arg1[%c0, %c0_0] : memref<8x16xf32, #tpu.memory_space<vmem>>, vector<8x16xf32>
    %c0_1 = arith.constant 0 : index
    %c0_2 = arith.constant 0 : index
    %1 = vector.load %arg2[%c0_1, %c0_2] : memref<16x128xf32, #tpu.memory_space<vmem>>, vector<16x128xf32>
    %cst = arith.constant dense<0.000000e+00> : vector<8x128xf32>
    %2 = tpu.matmul %0, %1, %cst {dimension_numbers = #tpu.dot_dimension_numbers<[1], [0], [0], [1], [0, 0, 1, 1], [], []>} : vector<8x16xf32>, vector<16x128xf32>, vector<8x128xf32> -> vector<8x128xf32>
    %c0_3 = arith.constant 0 : index
    %c0_4 = arith.constant 0 : index
    %3 = vector.load %arg3[%c0_3, %c0_4] : memref<1x128xf32, #tpu.memory_space<vmem>>, vector<1x128xf32>
    %4 = vector.broadcast %3 : vector<1x128xf32> to vector<8x128xf32>
    %5 = arith.addf %2, %4 : vector<8x128xf32>
    %6 = arith.negf %5 : vector<8x128xf32>
    %7 = math.exp %6 : vector<8x128xf32>
    %cst_5 = arith.constant 1.000000e+00 : f32
    %8 = vector.broadcast %cst_5 : f32 to vector<8x128xf32>
    %9 = arith.addf %8, %7 : vector<8x128xf32>
    %10 = arith.divf %8, %9 : vector<8x128xf32>
    %c0_6 = arith.constant 0 : index
    %c0_7 = arith.constant 0 : index
    %11 = vector.load %arg4[%c0_6, %c0_7] : memref<128x128xf32, #tpu.memory_space<vmem>>, vector<128x128xf32>
    %cst_8 = arith.constant dense<0.000000e+00> : vector<8x128xf32>
    %12 = tpu.matmul %10, %11, %cst_8 {dimension_numbers = #tpu.dot_dimension_numbers<[1], [0], [0], [1], [0, 0, 1, 1], [], []>} : vector<8x128xf32>, vector<128x128xf32>, vector<8x128xf32> -> vector<8x128xf32>
    %c0_9 = arith.constant 0 : index
    %c0_10 = arith.constant 0 : index
    %13 = vector.load %arg5[%c0_9, %c0_10] : memref<1x128xf32, #tpu.memory_space<vmem>>, vector<1x128xf32>
    %14 = vector.broadcast %13 : vector<1x128xf32> to vector<8x128xf32>
    %15 = arith.addf %12, %14 : vector<8x128xf32>
    %16 = arith.negf %15 : vector<8x128xf32>
    %17 = math.exp %16 : vector<8x128xf32>
    %cst_11 = arith.constant 1.000000e+00 : f32
    %18 = vector.broadcast %cst_11 : f32 to vector<8x128xf32>
    %19 = arith.addf %18, %17 : vector<8x128xf32>
    %20 = arith.divf %18, %19 : vector<8x128xf32>
    %c0_12 = arith.constant 0 : index
    %c0_13 = arith.constant 0 : index
    %21 = vector.load %arg6[%c0_12, %c0_13] : memref<8x128xf32, #tpu.memory_space<vmem>>, vector<8x128xf32>
    tpu.vector_store %arg6[%c0_12, %c0_13], %20 {strides = array<i32>} : memref<8x128xf32, #tpu.memory_space<vmem>>, vector<8x128xf32>,
    return
  }
  func.func @transform_0(%arg0: i32) -> (i32, i32) {
    %c0_i32 = arith.constant 0 : i32
    %c0_i32_0 = arith.constant 0 : i32
    return %arg0, %c0_i32 : i32, i32
  }
  func.func @transform_1(%arg0: i32) -> (i32, i32) {
    %c0_i32 = arith.constant 0 : i32
    %c0_i32_0 = arith.constant 0 : i32
    %c0_i32_1 = arith.constant 0 : i32
    return %c0_i32, %c0_i32_0 : i32, i32
  }
  func.func @transform_2(%arg0: i32) -> (i32, i32) {
    %c0_i32 = arith.constant 0 : i32
    %c0_i32_0 = arith.constant 0 : i32
    %c0_i32_1 = arith.constant 0 : i32
    return %c0_i32, %c0_i32_0 : i32, i32
  }
  func.func @transform_3(%arg0: i32) -> (i32, i32) {
    %c0_i32 = arith.constant 0 : i32
    %c0_i32_0 = arith.constant 0 : i32
    %c0_i32_1 = arith.constant 0 : i32
    return %c0_i32, %c0_i32_0 : i32, i32
  }
  func.func @transform_4(%arg0: i32) -> (i32, i32) {
    %c0_i32 = arith.constant 0 : i32
    %c0_i32_0 = arith.constant 0 : i32
    %c0_i32_1 = arith.constant 0 : i32
    return %c0_i32, %c0_i32_0 : i32, i32
  }
  func.func @transform_5(%arg0: i32) -> (i32, i32) {
    %c0_i32 = arith.constant 0 : i32
    %c0_i32_0 = arith.constant 0 : i32
    return %arg0, %c0_i32 : i32, i32
  }
}

</mosaic_0001>

<bundles_post_ra>
// kernel: tpu_custom_call.1
= control target key start
LH: loop header
LB: loop body
LE: loop exit
PB: predicated region body
PF: predicated region fallthrough
CT: control target
= control target key end

     0   :  { %10 = vsyncpa [#allocation3], 0  ;;  %s369_s0 = inlined_call_operand.hbm [shape: f32[8,16], index: 0, kind: input, shape index: {}]   ;;  %s370_s1 = inlined_call_operand.hbm [shape: f32[16,128], index: 1, kind: input, shape index: {}]   ;;  %s371_s2 = inlined_call_operand.vmem [shape: f32[1,128], index: 2, kind: input, shape index: {}]   ;;  %s372_s3 = inlined_call_operand.hbm [shape: f32[128,128], index: 3, kind: input, shape index: {}]   ;;  %s373_s4 = inlined_call_operand.vmem [shape: f32[1,128], index: 4, kind: input, shape index: {}]   ;;  %s374_s5 = inlined_call_operand.hbm [shape: f32[8,128], index: 5, kind: output, shape index: {}]  }
   0x1   :  { %11 = vsyncpa [#allocation6], 0  ;;  %s28_s20 = sshll.u32 %s370_s1, 4  ;;  %s29_s20 = int_to_ptr.hbm [resolvable:$true] %s28_s20 }
   0x2   :  { %12 = vsyncpa [#allocation4], 0  ;;  %s315_s21 = smov [#allocation5]   ;;  %s18_s25 = sshll.u32 %s369_s0, 4  ;;  %s19_s25 = int_to_ptr.hbm [resolvable:$true] %s18_s25 }
   0x3   :  { %s30_s22 = sshll.u32 %s315_s21, 4  ;;  %s316_s26 = smov 128   ;;  %s31_s22 = int_to_ptr.vmem [resolvable:$true] %s30_s22 }
   0x4   :  { %s317_s27 = smov 8   ;;  %s318_s28 = smov [#allocation2]  }
   0x5   :  { %36 = dma.hbm_to_vmem [thread:$0]  %s29_s20, 256, %s31_s22, [#allocation6], %s316_s26, %s316_s26, %s317_s27  }
   0x6   :  { %s20_s29 = sshll.u32 %s318_s28, 4  ;;  %s43_s7 = sshll.u32 %s372_s3, 4  ;;  %s21_s29 = int_to_ptr.vmem [resolvable:$true] %s20_s29  ;;  %s44_s7 = int_to_ptr.hbm [resolvable:$true] %s43_s7 }
   0x7   :  { %23 = dma.hbm_to_vmem [thread:$0]  %s19_s25, 128, %s21_s29, [#allocation3]  }
   0x8   :  { %s319_s1 = smov [#allocation7]  }
   0x9   :  { %s45_s8 = sshll.u32 %s319_s1, 4  ;;  %s46_s8 = int_to_ptr.vmem [resolvable:$true] %s45_s8 }
   0xa   :  { %51 = dma.hbm_to_vmem [thread:$0]  %s44_s7, 2048, %s46_s8, [#allocation6], %s316_s26, %s316_s26, %s317_s27  }
   0xb   :  { %309 = dma.done.wait [#allocation3], 128  }
   0xc   :  { %310 = vsyncadd [#allocation3], 4294967168 }
   0xd   :  { %311 = dma.done.wait [#allocation6], 2304  }
   0xe   :  { %312 = vsyncadd [#allocation6], 4294964992  ;;  %v68_v0 = vld [vmem:[#allocation5 + $0x8] sm:$0xff]  ;;  %v67_v1 = vld [vmem:[#allocation5] sm:$0xff]  ;;  %vm73_vm0 = vcmask 130048   ;;  %s320_s10 = smov [#allocation8]  }
   0xf   :  { %91 = vmatpush.msra.mxu0 %v68_v0  ;;  %v66_v2 = vld [vmem:[#allocation2] sm:$0xff]  ;;  %v131_v3 = vld [vmem:[#allocation7 + $0x78] sm:$0xff]  ;;  %v130_v4 = vld [vmem:[#allocation7 + $0x70] sm:$0xff]  ;;  %s181_s11 = sshll.u32 %s320_s10, 4  ;;  %s182_s11 = int_to_ptr.vmem [resolvable:$true] %s181_s11 }
  0x10   :  { %136 = vmatpush.msra.mxu1 %v131_v3  ;;  %v129_v5 = vld [vmem:[#allocation7 + $0x68] sm:$0xff]  ;;  %v128_v6 = vld [vmem:[#allocation7 + $0x60] sm:$0xff]  ;;  %v127_v7 = vld [vmem:[#allocation7 + $0x58] sm:$0xff] }
  0x11   :  { %92 = vmatpush.msra.mxu0 %v67_v1  ;;  %v126_v8 = vld [vmem:[#allocation7 + $0x50] sm:$0xff]  ;;  %v125_v9 = vld [vmem:[#allocation7 + $0x48] sm:$0xff]  ;;  %v124_v10 = vld [vmem:[#allocation7 + $0x40] sm:$0xff] }
  0x12   :  { %194 = vmatmul.msk.f32.vlgmr.msra.gmra.mxu0 %vm73_vm0, %v66_v2  ;;  %137 = vmatpush.msra.mxu1 %v130_v4  ;;  %v123_v11 = vld [vmem:[#allocation7 + $0x38] sm:$0xff]  ;;  %v122_v12 = vld [vmem:[#allocation7 + $0x30] sm:$0xff]  ;;  %v121_v13 = vld [vmem:[#allocation7 + $0x28] sm:$0xff] }
  0x13   :  { %v120_v14 = vld [vmem:[#allocation7 + $0x20] sm:$0xff]  ;;  %v119_v15 = vld [vmem:[#allocation7 + $0x18] sm:$0xff]  ;;  %v118_v16 = vld [vmem:[#allocation7 + $0x10] sm:$0xff] }
  0x14   :  { %138 = vmatpush.msra.mxu1 %v129_v5  ;;  %v117_v17 = vld [vmem:[#allocation7 + $0x8] sm:$0xff]  ;;  %v116_v18 = vld [vmem:[#allocation7] sm:$0xff] }
  0x15   :  { %v203_v19 = vld [vmem:[%s371_s2] ss:$0 sm:$0xff] }
  0x16   :  { %139 = vmatpush.msra.mxu1 %v128_v6  ;;  %v204_v35 = vld [vmem:[%s373_s4] ss:$0 sm:$0xff]  ;;  %s183_s4 = sshll.u32 %s374_s5, 4  ;;  %s184_s4 = int_to_ptr.hbm [resolvable:$true] %s183_s4 }
  0x18   :  { %140 = vmatpush.msra.mxu1 %v127_v7 }
  0x1a   :  { %141 = vmatpush.msra.mxu1 %v126_v8 }
  0x1c   :  { %142 = vmatpush.msra.mxu1 %v125_v9 }
  0x1e   :  { %143 = vmatpush.msra.mxu1 %v124_v10 }
  0x20   :  { %144 = vmatpush.msra.mxu1 %v123_v11 }
  0x22   :  { %145 = vmatpush.msra.mxu1 %v122_v12 }
  0x24   :  { %146 = vmatpush.msra.mxu1 %v121_v13 }
  0x26   :  { %147 = vmatpush.msra.mxu1 %v120_v14 }
  0x28   :  { %148 = vmatpush.msra.mxu1 %v119_v15 }
  0x2a   :  { %149 = vmatpush.msra.mxu1 %v118_v16 }
  0x2c   :  { %150 = vmatpush.msra.mxu1 %v117_v17 }
  0x2e   :  { %151 = vmatpush.msra.mxu1 %v116_v18 }
  0x8f   :  { %v94_v20 = vpop.f32.mrf.mxu0 }
  0x90   :  { %v95_v21 = vadd.f32 %v203_v19, %v94_v20 }
  0x92   :  { %v195_v22 = vmul.f32 -1.442695, %v95_v21 }
  0x94   :  { %205 = vpow2.f32 %v195_v22 }
  0x9a   :  { %v206_v23 = vpop.eup %205 }
  0x9b   :  { %v100_v24 = vadd.f32 1.0, %v206_v23 }
  0x9d   :  { %207 = vrcp.f32 %v100_v24  ;;  %v112_v28 = vand.u32 2147483648, %v100_v24  ;;  %v110_v30 = vand.u32 2147483647, %v100_v24  ;;  %vm106_vm2 = vweird.f32 %v100_v24 }
  0x9f   :  { %v113_v32 = vor.u32 1.1754944e-38, %v112_v28  ;;  %vm111_vm4 = vcmp.eq.f32.partialorder %v110_v30, 8.507059e+37 }
  0xa3   :  { %v208_v25 = vpop.eup %207 }
  0xa4   :  { %v102_v26 = vmul.f32 %v208_v25, %v100_v24  ;;  %vm107_vm1 = vweird.f32 %v208_v25 }
  0xa5   :  { %vm108_vm3 = vmor %vm106_vm2, %vm107_vm1 }
  0xa6   :  { %v103_v27 = vsub.f32 1.0, %v102_v26 }
  0xa8   :  { %v104_v29 = vmul.f32 %v208_v25, %v103_v27 }
  0xaa   :  { %v105_v31 = vadd.f32 %v208_v25, %v104_v29 }
  0xac   :  { %v109_v33 = vsel %vm108_vm3, %v208_v25, %v105_v31 }
  0xad   :  { %v114_v34 = vsel %vm111_vm4, %v113_v32, %v109_v33 }
  0xae   :  { %152 = vmatmul.f32.vlgmr.msra.gmra.mxu1 %v114_v34 }
 0x12b   :  { %v153_v36 = vpop.f32.mrf.mxu1 }
 0x12c   :  { %v154_v37 = vadd.f32 %v204_v35, %v153_v36 }
 0x12e   :  { %v196_v38 = vmul.f32 -1.442695, %v154_v37 }
 0x130   :  { %209 = vpow2.f32 %v196_v38 }
 0x136   :  { %v210_v39 = vpop.eup %209 }
 0x137   :  { %v159_v40 = vadd.f32 1.0, %v210_v39 }
 0x139   :  { %211 = vrcp.f32 %v159_v40  ;;  %v171_v44 = vand.u32 2147483648, %v159_v40  ;;  %v169_v46 = vand.u32 2147483647, %v159_v40  ;;  %vm165_vm6 = vweird.f32 %v159_v40 }
 0x13b   :  { %v172_v48 = vor.u32 1.1754944e-38, %v171_v44  ;;  %vm170_vm8 = vcmp.eq.f32.partialorder %v169_v46, 8.507059e+37 }
 0x13f   :  { %v212_v41 = vpop.eup %211 }
 0x140   :  { %v161_v42 = vmul.f32 %v212_v41, %v159_v40  ;;  %vm166_vm5 = vweird.f32 %v212_v41 }
 0x141   :  { %vm167_vm7 = vmor %vm165_vm6, %vm166_vm5 }
 0x142   :  { %v162_v43 = vsub.f32 1.0, %v161_v42 }
 0x144   :  { %v163_v45 = vmul.f32 %v212_v41, %v162_v43 }
 0x146   :  { %v164_v47 = vadd.f32 %v212_v41, %v163_v45 }
 0x148   :  { %v168_v49 = vsel %vm167_vm7, %v212_v41, %v164_v47 }
 0x149   :  { %v173_v50 = vsel %vm170_vm8, %v172_v48, %v168_v49 }
 0x14a   :  { %175 = vst [vmem:[#allocation8] sm:$0xff] %v173_v50 }
 0x14b   :  { %186 = dma.vmem_to_hbm [thread:$0]  %s182_s11, 128, %s184_s4, [#allocation4]  }
 0x14c   :  { %313 = dma.done.wait [#allocation4], 128  }
 0x14d   :  { %314 = vsyncadd [#allocation4], 4294967168 }
 0x14e   :  { %191 = vsyncpa [#allocation3], 1 }
 0x14f   :  { %192 = vsyncpa [#allocation6], 1 }
 0x150   :  { %193 = vsyncpa [#allocation4], 1 }

</bundles_post_ra>
